<compile_context>
chip_gen: v6e
topology: v6e:2x2x1
jax: 0.10.0
libtpu: 0.0.40
codegen_flags: <defaults>
</compile_context>

<pallas_src>
import jax
import jax.numpy as jnp
from jax.experimental import pallas as pl
from jax.experimental.pallas import tpu as pltpu


def _round_up(x, m):
    return ((x + m - 1) // m) * m


def _cdiv(a, b):
    return (a + b - 1) // b


def _pad_dim(d):
    # 128-lane alignment always; bump to 256 (MXU width on v6e/v7x) only when the
    # extra padding is cheap (<= 12.5%).
    p = _round_up(d, 128)
    if p >= 1024 and p % 256 != 0:
        p = _round_up(p, 256)
    return p


def _default_vmem_budget():
    cap = None
    try:
        info = pltpu.get_tpu_info()
        for attr in ("vmem_capacity_bytes", "vmem_size_bytes", "vmem_bytes"):
            v = getattr(info, attr, None)
            if v:
                cap = int(v)
                break
    except Exception:
        cap = None
    if not cap:
        cap = 64 * 1024 * 1024  # conservative (v7x-sized) fallback
    # ~65% of physical: v5e/v6e (128 MiB) -> ~83 MiB, v7x (64 MiB) -> ~42 MiB
    return int(min(cap * 0.65, 100 * 1024 * 1024))


# ---------------------------------------------------------------------------
# Kernels
# ---------------------------------------------------------------------------
def _ae_kernel_fused(x_ref, w_enc_ref, b_enc_ref, w_dec_ref, b_dec_ref, o_ref):
    # x: (TB, D_pad) compute dtype; weights compute dtype; biases f32.
    h = jnp.dot(x_ref[...], w_enc_ref[...], preferred_element_type=jnp.float32)
    h = jnp.maximum(h + b_enc_ref[...], 0.0)          # bias + ReLU in f32
    h = h.astype(w_dec_ref.dtype)
    y = jnp.dot(h, w_dec_ref[...], preferred_element_type=jnp.float32)
    o_ref[...] = (y + b_dec_ref[...]).astype(o_ref.dtype)


def _ae_kernel_htiled(x_ref, w_enc_ref, b_enc_ref, w_dec_ref, b_dec_ref,
                      o_ref, acc_ref):
    # Hidden dim tiled: grid axis 1 walks hidden tiles; acc_ref is an f32
    # accumulator for the decoder partial products.
    j = pl.program_id(1)

    @pl.when(j == 0)
    def _init():
        acc_ref[...] = jnp.zeros_like(acc_ref)

    h = jnp.dot(x_ref[...], w_enc_ref[...], preferred_element_type=jnp.float32)
    h = jnp.maximum(h + b_enc_ref[...], 0.0)
    h = h.astype(w_dec_ref.dtype)
    acc_ref[...] += jnp.dot(h, w_dec_ref[...], preferred_element_type=jnp.float32)

    @pl.when(j == pl.num_programs(1) - 1)
    def _finalize():
        o_ref[...] = (acc_ref[...] + b_dec_ref[...]).astype(o_ref.dtype)


# ---------------------------------------------------------------------------
# Parameter preparation (hoisted out of the per-call forward)
# ---------------------------------------------------------------------------
def prepare_params(w_enc, b_enc, w_dec, b_dec, *, compute_dtype=jnp.bfloat16,
                   vmem_budget_bytes=None, hidden_tile=None):
    """Pad + cast parameters once. w_enc:(D_in,H), w_dec:(H,D_in), biases (1,H)/(1,D_in) or 1-D."""
    if vmem_budget_bytes is None:
        vmem_budget_bytes = _default_vmem_budget()
    D_in, H = w_enc.shape
    assert w_dec.shape == (H, D_in)
    cbytes = jnp.dtype(compute_dtype).itemsize

    D_pad = _pad_dim(D_in)
    H_pad = _pad_dim(H)

    # Hidden tile: keep both full weights VMEM-resident (single-buffered) when the
    # pair fits in ~half the budget; otherwise tile the hidden dim.
    if hidden_tile is not None:
        th = min(_round_up(int(hidden_tile), 128), H_pad)
    elif 2 * D_pad * H_pad * cbytes <= vmem_budget_bytes // 2:
        th = H_pad
    else:
        # double-buffered (w_enc, w_dec) tile pair should take <= ~40% of budget
        th = ((vmem_budget_bytes * 2 // 5) // (4 * D_pad * cbytes) // 128) * 128
        th = max(128, min(th, H_pad))
    H_pad = _round_up(H_pad, th)  # make H_pad divisible by the hidden tile

    # Zero padding keeps the math exact: padded encoder columns give h=0, ReLU(0)=0,
    # padded decoder rows contribute 0, padded output columns are sliced off.
    w_enc_p = jnp.zeros((D_pad, H_pad), compute_dtype).at[:D_in, :H].set(
        w_enc.astype(compute_dtype))
    w_dec_p = jnp.zeros((H_pad, D_pad), compute_dtype).at[:H, :D_in].set(
        w_dec.astype(compute_dtype))
    b_enc_p = jnp.zeros((1, H_pad), jnp.float32).at[:, :H].set(
        b_enc.astype(jnp.float32).reshape(1, H))
    b_dec_p = jnp.zeros((1, D_pad), jnp.float32).at[:, :D_in].set(
        b_dec.astype(jnp.float32).reshape(1, D_in))

    return dict(w_enc=w_enc_p, b_enc=b_enc_p, w_dec=w_dec_p, b_dec=b_dec_p,
                input_dim=D_in, hidden_dim=H, d_pad=D_pad, h_pad=H_pad,
                hidden_tile=th, compute_dtype=compute_dtype,
                vmem_budget_bytes=int(vmem_budget_bytes))


# ---------------------------------------------------------------------------
# Forward
# ---------------------------------------------------------------------------
def embedding_autoencoder(x, params, *, full_precision_output=False):
    """relu(x @ W_enc + b_enc) @ W_dec + b_dec as one Pallas call. x: (B, D_in)."""
    B, D_in = x.shape
    assert D_in == params["input_dim"]
    compute_dtype = params["compute_dtype"]
    cbytes = jnp.dtype(compute_dtype).itemsize
    D_pad, H_pad, th = params["d_pad"], params["h_pad"], params["hidden_tile"]
    num_h_tiles = H_pad // th
    budget = params["vmem_budget_bytes"]
    headroom = 2 * 1024 * 1024  # Mosaic internal scratch / regalloc slack

    # Kernel-side output dtype: 2-byte writeback unless f32 explicitly requested.
    if full_precision_output:
        kernel_out_dtype = jnp.float32
    elif jnp.dtype(x.dtype).itemsize <= 2:
        kernel_out_dtype = x.dtype
    else:
        kernel_out_dtype = compute_dtype
    obytes = jnp.dtype(kernel_out_dtype).itemsize

    # ---- VMEM accounting: resident (batch-independent) + per-batch-row bytes ----
    if num_h_tiles == 1:
        fixed = (2 * D_pad * H_pad * cbytes          # both weights, single-buffered
                 + (H_pad + D_pad) * 4)              # biases, single-buffered
        per_row = (2 * D_pad * cbytes                # x tile (double-buffered)
                   + 2 * D_pad * obytes              # out tile (double-buffered)
                   + H_pad * 4 + H_pad * cbytes      # h in f32 + compute-dtype copy
                   + D_pad * 4)                      # y in f32 before the store cast
    else:
        fixed = (4 * D_pad * th * cbytes             # w_enc/w_dec tiles, double-buffered
                 + 2 * th * 4                        # b_enc tile, double-buffered
                 + D_pad * 4)                        # b_dec, single-buffered
        per_row = (2 * D_pad * cbytes                # x tile
                   + 2 * D_pad * obytes              # out tile
                   + D_pad * 4                       # f32 accumulator scratch
                   + th * 4 + th * cbytes            # h in f32 + compute-dtype copy
                   + D_pad * 4)                      # partial decoder product (f32)

    avail = budget - fixed - headroom
    tb_max = max(16, (int(avail // per_row) // 16) * 16) if avail > 0 else 16
    tb_max = min(tb_max, 1024)

    # ---- batch tiling: prefer >=2 (even) steps when the batch allows (v7x 2 TCs) ----
    B_pad = _round_up(B, 16)                         # 16 = bf16 sublane pack
    tb = min(tb_max, B_pad)
    steps = _cdiv(B_pad, tb)
    if steps == 1 and B_pad >= 32:
        steps = 2
    if steps > 1 and steps % 2 == 1:
        steps += 1
    tb = _round_up(_cdiv(B_pad, steps), 16)
    B_pad = steps * tb

    # ---- pad / cast activations only when actually needed ----
    if B == B_pad and D_in == D_pad and x.dtype == compute_dtype:
        xp = x
    else:
        xp = jnp.zeros((B_pad, D_pad), compute_dtype).at[:B, :D_in].set(
            x.astype(compute_dtype))

    flops = 4 * B_pad * D_pad * H_pad
    bytes_accessed = (B_pad * D_pad * cbytes
                      + 2 * D_pad * H_pad * cbytes * (1 if num_h_tiles == 1 else steps)
                      + (H_pad + D_pad) * 4
                      + B_pad * D_pad * obytes)

    if num_h_tiles == 1:
        kernel = _ae_kernel_fused
        grid = (steps,)
        in_specs = [
            pl.BlockSpec((tb, D_pad), lambda i: (i, 0)),
            # constant index_maps + single buffer: weights/biases stay VMEM-resident
            pl.BlockSpec((D_pad, H_pad), lambda i: (0, 0), pipeline_mode=pl.Buffered(1)),
            pl.BlockSpec((1, H_pad), lambda i: (0, 0), pipeline_mode=pl.Buffered(1)),
            pl.BlockSpec((H_pad, D_pad), lambda i: (0, 0), pipeline_mode=pl.Buffered(1)),
            pl.BlockSpec((1, D_pad), lambda i: (0, 0), pipeline_mode=pl.Buffered(1)),
        ]
        out_specs = pl.BlockSpec((tb, D_pad), lambda i: (i, 0))
        scratch_shapes = []
        dim_sem = ("parallel",)
    else:
        kernel = _ae_kernel_htiled
        grid = (steps, num_h_tiles)
        in_specs = [
            pl.BlockSpec((tb, D_pad), lambda i, j: (i, 0)),
            pl.BlockSpec((D_pad, th), lambda i, j: (0, j)),
            pl.BlockSpec((1, th), lambda i, j: (0, j)),
            pl.BlockSpec((th, D_pad), lambda i, j: (j, 0)),
            pl.BlockSpec((1, D_pad), lambda i, j: (0, 0), pipeline_mode=pl.Buffered(1)),
        ]
        out_specs = pl.BlockSpec((tb, D_pad), lambda i, j: (i, 0))
        scratch_shapes = [pltpu.VMEM((tb, D_pad), jnp.float32)]
        dim_sem = ("parallel", "arbitrary")

    out = pl.pallas_call(
        kernel,
        out_shape=jax.ShapeDtypeStruct((B_pad, D_pad), kernel_out_dtype),
        grid_spec=pltpu.PrefetchScalarGridSpec(
            num_scalar_prefetch=0,
            grid=grid,
            in_specs=in_specs,
            out_specs=out_specs,
            scratch_shapes=scratch_shapes),
        compiler_params=pltpu.CompilerParams(
            dimension_semantics=dim_sem,
            vmem_limit_bytes=int(budget)),       # same number the tiling was sized to
        cost_estimate=pl.CostEstimate(
            flops=int(flops), transcendentals=0,
            bytes_accessed=int(bytes_accessed)),
    )(xp, params["w_enc"], params["b_enc"], params["w_dec"], params["b_dec"])

    return out[:B, :D_in].astype(x.dtype)


# ---------------------------------------------------------------------------
# Init + reference (mirrors the kernel's bf16-operand / f32-accumulate strategy)
# ---------------------------------------------------------------------------
def init_params(key, input_dim, hidden_dim):
    # Deterministic init mimicking nn.Linear's uniform(-1/sqrt(fan_in), 1/sqrt(fan_in)).
    k1, k2, k3, k4 = jax.random.split(key, 4)
    bound_enc = 1.0 / jnp.sqrt(input_dim)
    bound_dec = 1.0 / jnp.sqrt(hidden_dim)
    # Stored as (in, out) -- the transpose of PyTorch's (out, in) weight layout.
    w_enc = jax.random.uniform(k1, (input_dim, hidden_dim), jnp.float32,
                               -bound_enc, bound_enc)
    b_enc = jax.random.uniform(k2, (1, hidden_dim), jnp.float32,
                               -bound_enc, bound_enc)
    w_dec = jax.random.uniform(k3, (hidden_dim, input_dim), jnp.float32,
                               -bound_dec, bound_dec)
    b_dec = jax.random.uniform(k4, (1, input_dim), jnp.float32,
                               -bound_dec, bound_dec)
    return w_enc, b_enc, w_dec, b_dec


def reference_forward(x, w_enc, b_enc, w_dec, b_dec, compute_dtype=jnp.bfloat16):
    cd = compute_dtype
    h = jnp.dot(x.astype(cd), w_enc.astype(cd), preferred_element_type=jnp.float32)
    h = jnp.maximum(h + b_enc.astype(jnp.float32).reshape(1, -1), 0.0)
    y = jnp.dot(h.astype(cd), w_dec.astype(cd), preferred_element_type=jnp.float32)
    return y + b_dec.astype(jnp.float32).reshape(1, -1)


if __name__ == "__main__":
    key = jax.random.PRNGKey(0)
    kx, kp, kx2, kp2 = jax.random.split(key, 4)

    # --- case 1: small model, fully VMEM-resident weights (fused path) ---
    BATCH, INPUT_DIM, HIDDEN_DIM = 8, 64, 32
    x = jax.random.normal(kx, (BATCH, INPUT_DIM), jnp.float32)
    w_enc, b_enc, w_dec, b_dec = init_params(kp, INPUT_DIM, HIDDEN_DIM)
    params = prepare_params(w_enc, b_enc, w_dec, b_dec)
    out = jax.block_until_ready(embedding_autoencoder(x, params))
    ref = reference_forward(x, w_enc, b_enc, w_dec, b_dec)
    assert out.shape == (BATCH, INPUT_DIM)
    assert out.dtype == x.dtype
    assert jnp.allclose(out, ref, atol=2e-2, rtol=2e-2)

    # --- case 2: exercise the hidden-dim-tiled fallback (multi-step grid) ---
    B2, D2, H2 = 24, 256, 384
    x2 = jax.random.normal(kx2, (B2, D2), jnp.float32)
    w_enc2, b_enc2, w_dec2, b_dec2 = init_params(kp2, D2, H2)
    params2 = prepare_params(w_enc2, b_enc2, w_dec2, b_dec2, hidden_tile=128)
    out2 = jax.block_until_ready(embedding_autoencoder(x2, params2))
    ref2 = reference_forward(x2, w_enc2, b_enc2, w_dec2, b_dec2)
    assert out2.shape == (B2, D2)
    assert out2.dtype == x2.dtype
    assert jnp.allclose(out2, ref2, atol=2e-2, rtol=2e-2)

    print("KERNEL_OK")
</pallas_src>

<mosaic_0001>
module attributes {stable_mosaic.version = 11 : i64} {
  func.func @_ae_kernel_fused(%arg0: i32, %arg1: memref<16x128xbf16, #tpu.memory_space<vmem>>, %arg2: memref<128x128xbf16, #tpu.memory_space<vmem>>, %arg3: memref<1x128xf32, #tpu.memory_space<vmem>>, %arg4: memref<128x128xbf16, #tpu.memory_space<vmem>>, %arg5: memref<1x128xf32, #tpu.memory_space<vmem>>, %arg6: memref<16x128xbf16, #tpu.memory_space<vmem>>) attributes {dimension_semantics = [#tpu.dimension_semantics<parallel>], iteration_bounds = array<i64: 1>, scalar_prefetch = 0 : i64, scratch_operands = 0 : i64, tpu.core_type = #tpu.core_type<tc>, window_params = [{transform_indices = @transform_0, window_bounds = array<i64: 16, 128>}, {pipeline_mode = #tpu.pipeline_mode<synchronous>, transform_indices = @transform_1, window_bounds = array<i64: 128, 128>}, {pipeline_mode = #tpu.pipeline_mode<synchronous>, transform_indices = @transform_2, window_bounds = array<i64: 1, 128>}, {pipeline_mode = #tpu.pipeline_mode<synchronous>, transform_indices = @transform_3, window_bounds = array<i64: 128, 128>}, {pipeline_mode = #tpu.pipeline_mode<synchronous>, transform_indices = @transform_4, window_bounds = array<i64: 1, 128>}, {transform_indices = @transform_5, window_bounds = array<i64: 16, 128>}]} {
    %c0 = arith.constant 0 : index
    %c0_0 = arith.constant 0 : index
    %0 = vector.load %arg1[%c0, %c0_0] : memref<16x128xbf16, #tpu.memory_space<vmem>>, vector<16x128xbf16>
    %c0_1 = arith.constant 0 : index
    %c0_2 = arith.constant 0 : index
    %1 = vector.load %arg2[%c0_1, %c0_2] : memref<128x128xbf16, #tpu.memory_space<vmem>>, vector<128x128xbf16>
    %cst = arith.constant dense<0.000000e+00> : vector<16x128xf32>
    %2 = tpu.matmul %0, %1, %cst {dimension_numbers = #tpu.dot_dimension_numbers<[1], [0], [0], [1], [0, 0, 1, 1], [], []>} : vector<16x128xbf16>, vector<128x128xbf16>, vector<16x128xf32> -> vector<16x128xf32>
    %c0_3 = arith.constant 0 : index
    %c0_4 = arith.constant 0 : index
    %3 = vector.load %arg3[%c0_3, %c0_4] : memref<1x128xf32, #tpu.memory_space<vmem>>, vector<1x128xf32>
    %4 = vector.broadcast %3 : vector<1x128xf32> to vector<16x128xf32>
    %5 = arith.addf %2, %4 : vector<16x128xf32>
    %cst_5 = arith.constant 0.000000e+00 : f32
    %6 = vector.broadcast %cst_5 : f32 to vector<16x128xf32>
    %7 = arith.maximumf %5, %6 : vector<16x128xf32>
    %8 = arith.truncf %7 : vector<16x128xf32> to vector<16x128xbf16>
    %c0_6 = arith.constant 0 : index
    %c0_7 = arith.constant 0 : index
    %9 = vector.load %arg4[%c0_6, %c0_7] : memref<128x128xbf16, #tpu.memory_space<vmem>>, vector<128x128xbf16>
    %cst_8 = arith.constant dense<0.000000e+00> : vector<16x128xf32>
    %10 = tpu.matmul %8, %9, %cst_8 {dimension_numbers = #tpu.dot_dimension_numbers<[1], [0], [0], [1], [0, 0, 1, 1], [], []>} : vector<16x128xbf16>, vector<128x128xbf16>, vector<16x128xf32> -> vector<16x128xf32>
    %c0_9 = arith.constant 0 : index
    %c0_10 = arith.constant 0 : index
    %11 = vector.load %arg5[%c0_9, %c0_10] : memref<1x128xf32, #tpu.memory_space<vmem>>, vector<1x128xf32>
    %12 = vector.broadcast %11 : vector<1x128xf32> to vector<16x128xf32>
    %13 = arith.addf %10, %12 : vector<16x128xf32>
    %14 = arith.truncf %13 : vector<16x128xf32> to vector<16x128xbf16>
    %c0_11 = arith.constant 0 : index
    %c0_12 = arith.constant 0 : index
    %15 = vector.load %arg6[%c0_11, %c0_12] : memref<16x128xbf16, #tpu.memory_space<vmem>>, vector<16x128xbf16>
    tpu.vector_store %arg6[%c0_11, %c0_12], %14 {strides = array<i32>} : memref<16x128xbf16, #tpu.memory_space<vmem>>, vector<16x128xbf16>,
    return
  }
  func.func @transform_0(%arg0: i32) -> (i32, i32) {
    %c0_i32 = arith.constant 0 : i32
    %c0_i32_0 = arith.constant 0 : i32
    return %arg0, %c0_i32 : i32, i32
  }
  func.func @transform_1(%arg0: i32) -> (i32, i32) {
    %c0_i32 = arith.constant 0 : i32
    %c0_i32_0 = arith.constant 0 : i32
    %c0_i32_1 = arith.constant 0 : i32
    return %c0_i32, %c0_i32_0 : i32, i32
  }
  func.func @transform_2(%arg0: i32) -> (i32, i32) {
    %c0_i32 = arith.constant 0 : i32
    %c0_i32_0 = arith.constant 0 : i32
    %c0_i32_1 = arith.constant 0 : i32
    return %c0_i32, %c0_i32_0 : i32, i32
  }
  func.func @transform_3(%arg0: i32) -> (i32, i32) {
    %c0_i32 = arith.constant 0 : i32
    %c0_i32_0 = arith.constant 0 : i32
    %c0_i32_1 = arith.constant 0 : i32
    return %c0_i32, %c0_i32_0 : i32, i32
  }
  func.func @transform_4(%arg0: i32) -> (i32, i32) {
    %c0_i32 = arith.constant 0 : i32
    %c0_i32_0 = arith.constant 0 : i32
    %c0_i32_1 = arith.constant 0 : i32
    return %c0_i32, %c0_i32_0 : i32, i32
  }
  func.func @transform_5(%arg0: i32) -> (i32, i32) {
    %c0_i32 = arith.constant 0 : i32
    %c0_i32_0 = arith.constant 0 : i32
    return %arg0, %c0_i32 : i32, i32
  }
}

</mosaic_0001>

<bundles_post_ra>
// kernel: tpu_custom_call.1
= control target key start
LH: loop header
LB: loop body
LE: loop exit
PB: predicated region body
PF: predicated region fallthrough
CT: control target
= control target key end

     0   :  { %10 = vsyncpa [#allocation3], 0  ;;  %s591_s0 = inlined_call_operand.hbm [shape: bf16[16,128], index: 0, kind: input, shape index: {}]   ;;  %s592_s1 = inlined_call_operand.hbm [shape: bf16[128,128], index: 1, kind: input, shape index: {}]   ;;  %s593_s2 = inlined_call_operand.vmem [shape: f32[1,128], index: 2, kind: input, shape index: {}]   ;;  %s594_s3 = inlined_call_operand.hbm [shape: bf16[128,128], index: 3, kind: input, shape index: {}]   ;;  %s595_s4 = inlined_call_operand.vmem [shape: f32[1,128], index: 4, kind: input, shape index: {}]   ;;  %s596_s5 = inlined_call_operand.hbm [shape: bf16[16,128], index: 5, kind: output, shape index: {}]  }
   0x1   :  { %11 = vsyncpa [#allocation6], 0 }
   0x2   :  { %12 = vsyncpa [#allocation4], 0  ;;  %s523_s18 = smov [#allocation5]   ;;  %s524_s20 = smov [#allocation2]  }
   0x3   :  { %s30_s19 = sshll.u32 %s523_s18, 4  ;;  %s18_s21 = sshll.u32 %s524_s20, 4  ;;  %s31_s19 = int_to_ptr.vmem [resolvable:$true] %s30_s19  ;;  %s19_s21 = int_to_ptr.vmem [resolvable:$true] %s18_s21 }
   0x4   :  { %s445_s22 = scalar_lea.vmem %s31_s19, 1024  ;;  %p450_p1 = scmp.lt.s32.totalorder %s31_s19, %s31_s19 }
   0x5   :  { %p446_p0 = scmp.ne.s32.totalorder %s31_s19, %s445_s22  ;;  %p451_p2 = scmp.lt.s32.totalorder %s445_s22, %s445_s22 }
   0x7   :  { %p452_p3 = por %p451_p2, %p450_p1 }
   0x9   :  { %p453_p4 = pnand %p452_p3, %p446_p0 }
   0xb   :  { %456 = shalt.err (!%p453_p4)
}
   0xc   :  { %s525_s23 = smov 64   ;;  %s526_s24 = smov 4  }
   0xd   :  { %36 = dma.hbm_to_vmem [thread:$0]  %s592_s1, 1024, %s31_s19, [#allocation6], %s525_s23, %s525_s23, %s526_s24  }
   0xe   :  { %s465_s27 = scalar_lea.vmem %s19_s21, 128  ;;  %p470_p6 = scmp.lt.s32.totalorder %s19_s21, %s19_s21 }
   0xf   :  { %p466_p5 = scmp.ne.s32.totalorder %s19_s21, %s465_s27  ;;  %p471_p7 = scmp.lt.s32.totalorder %s465_s27, %s465_s27 }
  0x11   :  { %p472_p8 = por %p471_p7, %p470_p6 }
  0x13   :  { %p473_p9 = pnand %p472_p8, %p466_p5 }
  0x15   :  { %476 = shalt.err (!%p473_p9)
}
  0x16   :  { %24 = dma.hbm_to_vmem [thread:$0]  %s591_s0, 128, %s19_s21, [#allocation3], %s525_s23, %s525_s23, %s526_s24  }
  0x17   :  { %s527_s30 = smov [#allocation7]  }
  0x18   :  { %s44_s6 = sshll.u32 %s527_s30, 4  ;;  %s45_s6 = int_to_ptr.vmem [resolvable:$true] %s44_s6 }
  0x19   :  { %s485_s7 = scalar_lea.vmem %s45_s6, 1024  ;;  %p490_p11 = scmp.lt.s32.totalorder %s45_s6, %s45_s6 }
  0x1a   :  { %p486_p10 = scmp.ne.s32.totalorder %s45_s6, %s485_s7  ;;  %p491_p12 = scmp.lt.s32.totalorder %s485_s7, %s485_s7 }
  0x1c   :  { %p492_p13 = por %p491_p12, %p490_p11 }
  0x1e   :  { %p493_p0 = pnand %p492_p13, %p486_p10 }
  0x20   :  { %496 = shalt.err (!%p493_p0)
}
  0x21   :  { %50 = dma.hbm_to_vmem [thread:$0]  %s594_s3, 1024, %s45_s6, [#allocation6], %s525_s23, %s525_s23, %s526_s24  }
  0x22   :  { %517 = dma.done.wait [#allocation3], 128  }
  0x23   :  { %518 = vsyncadd [#allocation3], 4294967168 }
  0x24   :  { %519 = dma.done.wait [#allocation6], 2048  }
  0x25   :  { %520 = vsyncadd [#allocation6], 4294965248  ;;  %v528_v0 = vmov 0.0   ;;  %vm529_vm0 = vmmov 0   ;;  %v420_v1 = vld [vmem:[#allocation5 + $0x38] sm:$0xff]   ;;  %v421_v2 = vld [vmem:[#allocation5 + $0x30] sm:$0xff]  }
  0x26   :  { %372 = vmatprep.subr.bf16.mxu0 %v528_v0  ;;  %388 = vmatprep.mubr.msk.bf16.mxu0 %vm529_vm0, %v528_v0  ;;  %v422_v3 = vld [vmem:[#allocation5 + $0x28] sm:$0xff]   ;;  %v429_v4 = vld [vmem:[#allocation7 + $0x38] sm:$0xff]   ;;  %v423_v5 = vld [vmem:[#allocation5 + $0x20] sm:$0xff]   ;;  %s530_s11 = smov [#allocation8]  }
  0x27   :  { %392 = vmatprep.subr.bf16.mxu1 %v528_v0  ;;  %408 = vmatprep.mubr.msk.bf16.mxu1 %vm529_vm0, %v528_v0  ;;  %v430_v6 = vld [vmem:[#allocation7 + $0x30] sm:$0xff]   ;;  %v424_v7 = vld [vmem:[#allocation5 + $0x18] sm:$0xff]   ;;  %v431_v8 = vld [vmem:[#allocation7 + $0x28] sm:$0xff]   ;;  %s313_s12 = sshll.u32 %s530_s11, 4  ;;  %s314_s12 = int_to_ptr.vmem [resolvable:$true] %s313_s12 }
  0x28   :  { %373 = vmatpush3.bf16.msra.mxu0 %v420_v1  ;;  %393 = vmatpush3.bf16.msra.mxu1 %v429_v4  ;;  %v425_v9 = vld [vmem:[#allocation5 + $0x10] sm:$0xff]   ;;  %v432_v10 = vld [vmem:[#allocation7 + $0x20] sm:$0xff]   ;;  %v426_v11 = vld [vmem:[#allocation5 + $0x8] sm:$0xff]   ;;  %p502_p2 = scmp.lt.s32.totalorder %s314_s12, %s314_s12 }
  0x29   :  { %374 = vmatprep.subr.bf16.mxu0 %v528_v0  ;;  %394 = vmatprep.subr.bf16.mxu1 %v528_v0  ;;  %v433_v12 = vld [vmem:[#allocation7 + $0x18] sm:$0xff]   ;;  %v427_v13 = vld [vmem:[#allocation5] sm:$0xff]   ;;  %v434_v15 = vld [vmem:[#allocation7 + $0x10] sm:$0xff]  }
  0x2a   :  { %v428_v14 = vld [vmem:[#allocation2] sm:$0xff]   ;;  %v435_v16 = vld [vmem:[#allocation7 + $0x8] sm:$0xff]   ;;  %v436_v17 = vld [vmem:[#allocation7] sm:$0xff]  }
  0x2b   :  { %v326_v18 = vld [vmem:[%s593_s2] ss:$0 sm:$0xff]  ;;  %s497_s2 = scalar_lea.vmem %s314_s12, 128 }
  0x2c   :  { %375 = vmatpush3.bf16.msra.mxu0 %v421_v2  ;;  %395 = vmatpush3.bf16.msra.mxu1 %v430_v6  ;;  %v336_v29 = vld [vmem:[%s595_s4] ss:$0 sm:$0xff]  ;;  %p498_p1 = scmp.ne.s32.totalorder %s314_s12, %s497_s2  ;;  %p503_p3 = scmp.lt.s32.totalorder %s497_s2, %s497_s2 }
  0x2d   :  { %376 = vmatprep.subr.bf16.mxu0 %v528_v0  ;;  %396 = vmatprep.subr.bf16.mxu1 %v528_v0 }
  0x2e   :  { %p504_p4 = por %p503_p3, %p502_p2 }
  0x30   :  { %377 = vmatpush3.bf16.msra.mxu0 %v422_v3  ;;  %397 = vmatpush3.bf16.msra.mxu1 %v431_v8  ;;  %p505_p5 = pnand %p504_p4, %p498_p1 }
  0x31   :  { %378 = vmatprep.subr.bf16.mxu0 %v528_v0  ;;  %398 = vmatprep.subr.bf16.mxu1 %v528_v0 }
  0x34   :  { %379 = vmatpush3.bf16.msra.mxu0 %v423_v5  ;;  %399 = vmatpush3.bf16.msra.mxu1 %v432_v10 }
  0x35   :  { %380 = vmatprep.subr.bf16.mxu0 %v528_v0  ;;  %400 = vmatprep.subr.bf16.mxu1 %v528_v0 }
  0x38   :  { %381 = vmatpush3.bf16.msra.mxu0 %v424_v7  ;;  %401 = vmatpush3.bf16.msra.mxu1 %v433_v12 }
  0x39   :  { %382 = vmatprep.subr.bf16.mxu0 %v528_v0  ;;  %402 = vmatprep.subr.bf16.mxu1 %v528_v0 }
  0x3c   :  { %383 = vmatpush3.bf16.msra.mxu0 %v425_v9  ;;  %403 = vmatpush3.bf16.msra.mxu1 %v434_v15 }
  0x3d   :  { %384 = vmatprep.subr.bf16.mxu0 %v528_v0  ;;  %404 = vmatprep.subr.bf16.mxu1 %v528_v0 }
  0x40   :  { %385 = vmatpush3.bf16.msra.mxu0 %v426_v11  ;;  %405 = vmatpush3.bf16.msra.mxu1 %v435_v16 }
  0x41   :  { %386 = vmatprep.subr.bf16.mxu0 %v528_v0  ;;  %406 = vmatprep.subr.bf16.mxu1 %v528_v0 }
  0x44   :  { %387 = vmatpush3.bf16.msra.mxu0 %v427_v13  ;;  %407 = vmatpush3.bf16.msra.mxu1 %v436_v17 }
  0x47   :  { %389 = vmatmul.mubr.bf16.vlgmr.msra.gmra.mxu0 %v428_v14 }
 0x107   :  { %v176_v19 = vpop.f32.mrf.mxu0 }
 0x108   :  { %v177_v21 = vadd.f32 %v326_v18, %v176_v19 }
 0x109   :  { %v390_v20 = vpop.f32.mrf.mxu0 }
 0x10a   :  { %v183_v25 = vmax.f32 %v177_v21, 0.0 }
 0x10b   :  { %v179_v22 = vpop.f32.mrf.mxu0 }
 0x10c   :  { %v180_v23 = vadd.f32 %v326_v18, %v179_v22 }
 0x10d   :  { %v391_v24 = vpop.f32.mrf.mxu0 }
 0x10e   :  { %v184_v26 = vmax.f32 %v180_v23, 0.0 }
 0x110   :  { %v185_v27 = vpack.c.bf16 %v184_v26, %v183_v25 }
 0x112   :  { %409 = vmatmul.mubr.bf16.vlgmr.msra.gmra.mxu1 %v185_v27 }
 0x1d2   :  { %v291_v28 = vpop.f32.mrf.mxu1 }
 0x1d3   :  { %v292_v32 = vadd.f32 %v336_v29, %v291_v28 }
 0x1d4   :  { %v410_v30 = vpop.f32.mrf.mxu1 }
 0x1d6   :  { %v294_v31 = vpop.f32.mrf.mxu1 }
 0x1d7   :  { %v295_v33 = vadd.f32 %v336_v29, %v294_v31 }
 0x1d8   :  { %v411_v34 = vpop.f32.mrf.mxu1 }
 0x1d9   :  { %v352_v35 = vpack.c.bf16 %v295_v33, %v292_v32 }
 0x1db   :  { %353 = vst [vmem:[#allocation8] sm:$0xff] %v352_v35  }
 0x1dc   :  { %508 = shalt.err (!%p505_p5)
}
 0x1dd   :  { %319 = dma.vmem_to_hbm [thread:$0]  %s314_s12, 128, %s596_s5, [#allocation4], %s525_s23, %s525_s23, %s526_s24  }
 0x1de   :  { %521 = dma.done.wait [#allocation4], 128  }
 0x1df   :  { %522 = vsyncadd [#allocation4], 4294967168 }
 0x1e0   :  { %323 = vsyncpa [#allocation3], 1 }
 0x1e1   :  { %324 = vsyncpa [#allocation6], 1 }
 0x1e2   :  { %325 = vsyncpa [#allocation4], 1 }

</bundles_post_ra>
